<compile_context>
chip_gen: v7x
topology: tpu7x:2x2x1
jax: 0.10.0
libtpu: 0.0.40
codegen_flags: <defaults>
</compile_context>

<pallas_src>
import jax
import jax.numpy as jnp
from jax.experimental import pallas as pl
from jax.experimental.pallas import tpu as pltpu


def _round_up(n, m):
    return ((n + m - 1) // m) * m


def mlp_kernel(x_ref, w1_ref, b1_ref, w2_ref, b2_ref, w3t_ref, b3t_ref, ot_ref):
    x = x_ref[...]                                            # (bt, in_dim) bf16
    # fc1 + relu  (bf16 matmul, f32 accumulate, f32 elementwise)
    h1 = jnp.dot(x, w1_ref[...], preferred_element_type=jnp.float32) + b1_ref[...]
    h1 = jnp.maximum(h1, 0.0)
    # fc2 + relu
    h2 = jnp.dot(h1.astype(w2_ref.dtype), w2_ref[...],
                 preferred_element_type=jnp.float32) + b2_ref[...]
    h2 = jnp.maximum(h2, 0.0)
    # fc3, computed transposed: (out_dim, bt). Contract the feature axis of h2
    # directly so the MXU result is lane-dense (N = batch_tile), not N = 1.
    logits_t = jax.lax.dot_general(
        w3t_ref[...], h2.astype(w3t_ref.dtype),
        dimension_numbers=(((1,), (1,)), ((), ())),
        preferred_element_type=jnp.float32,
    ) + b3t_ref[...]                                          # (out_dim, bt)
    ot_ref[...] = jax.nn.sigmoid(logits_t)                    # lane-dense store


def mlp_forward(x, params, *, batch_tile=512, compute_dtype=jnp.bfloat16):
    """x: (B, input_dim). Returns sigmoid(fc3(relu(fc2(relu(fc1(x)))))) squeezed.

    Note: for very small B (a few rows) a plain jnp forward will beat the
    kernel-launch overhead; the Pallas path pays off for B in the thousands.
    """
    w1, b1, w2, b2, w3t, b3t = params
    B, in_dim = x.shape
    out_dim = w3t.shape[0]

    # Effective tile: multiple of 128, no larger than needed for small B.
    bt = min(batch_tile, _round_up(B, 128))
    Bp = _round_up(B, bt)
    if Bp != B:
        x = jnp.pad(x, ((0, Bp - B), (0, 0)))                 # zero-pad ragged tail

    # bf16 at the boundary: halves HBM traffic for x, doubles MXU issue rate.
    xc = x.astype(compute_dtype)
    w1c = w1.astype(compute_dtype)
    w2c = w2.astype(compute_dtype)
    w3tc = w3t.astype(compute_dtype)

    resident = lambda shape: pl.BlockSpec(shape, lambda i: (0, 0))  # stays in VMEM

    y_t = pl.pallas_call(
        mlp_kernel,
        out_shape=jax.ShapeDtypeStruct((out_dim, Bp), jnp.float32),
        grid=(Bp // bt,),
        in_specs=[
            pl.BlockSpec((bt, in_dim), lambda i: (i, 0)),     # x tile (moves)
            resident(w1c.shape), resident(b1.shape),
            resident(w2c.shape), resident(b2.shape),
            resident(w3tc.shape), resident(b3t.shape),
        ],
        out_specs=pl.BlockSpec((out_dim, bt), lambda i: (0, i)),  # lane-dense
        compiler_params=pltpu.CompilerParams(
            dimension_semantics=("parallel",)),
    )(xc, w1c, b1, w2c, b2, w3tc, b3t)

    y = y_t[:, :B].T                                          # (B, out_dim)
    # Mimic torch's .squeeze(): drops ALL size-1 dims (so B == 1 -> scalar).
    return jnp.squeeze(y)


def init_params(key, input_dim, output_dim):
    """Deterministic synthetic init matching nn.Linear default init.

    fc1/fc2 stored as (in, out) = W_torch.T ; fc3 stored as (out, in) = W_torch
    (applied transposed in the kernel); b3 stored as (out, 1).
    """
    ks = jax.random.split(key, 6)

    def linear(kw, kb, fan_in, fan_out):
        bound = 1.0 / jnp.sqrt(fan_in)
        w = jax.random.uniform(kw, (fan_in, fan_out), jnp.float32, -bound, bound)
        b = jax.random.uniform(kb, (1, fan_out), jnp.float32, -bound, bound)
        return w, b

    w1, b1 = linear(ks[0], ks[1], input_dim, 128)
    w2, b2 = linear(ks[2], ks[3], 128, 64)
    w3, b3 = linear(ks[4], ks[5], 64, output_dim)
    w3t = w3.T                       # (out_dim, 64)
    b3t = b3.T                       # (out_dim, 1)
    return (w1, b1, w2, b2, w3t, b3t)


if __name__ == "__main__":
    key = jax.random.PRNGKey(0)
    k_x, k_p = jax.random.split(key)

    # Ragged batch (1000) exercises the padding path; two 512-row tiles so the
    # grid has >= 2 parallel steps (both v7x TensorCores get work).
    B, input_dim, output_dim = 1000, 32, 1
    x = jax.random.normal(k_x, (B, input_dim), jnp.float32)
    params = init_params(k_p, input_dim, output_dim)

    out = mlp_forward(x, params)
    jax.block_until_ready(out)

    # Reference in plain JAX mirroring the kernel's bf16-input / f32-accum math.
    w1, b1, w2, b2, w3t, b3t = params
    bf = lambda a: a.astype(jnp.bfloat16).astype(jnp.float32)
    hp = jax.lax.Precision.HIGHEST
    h1 = jnp.maximum(jnp.dot(bf(x), bf(w1), precision=hp) + b1, 0.0)
    h2 = jnp.maximum(jnp.dot(bf(h1), bf(w2), precision=hp) + b2, 0.0)
    logits = jnp.dot(bf(h2), bf(w3t).T, precision=hp) + b3t.T
    ref = jnp.squeeze(jax.nn.sigmoid(logits))

    assert out.shape == (B,), out.shape
    max_err = float(jnp.max(jnp.abs(out - ref)))
    assert jnp.allclose(out, ref, atol=1e-3), max_err

    print("KERNEL_OK")
</pallas_src>

<mosaic_0001>
module attributes {stable_mosaic.version = 11 : i64} {
  func.func @mlp_kernel(%arg0: i32, %arg1: memref<512x32xbf16, #tpu.memory_space<vmem>>, %arg2: memref<32x128xbf16, #tpu.memory_space<vmem>>, %arg3: memref<1x128xf32, #tpu.memory_space<vmem>>, %arg4: memref<128x64xbf16, #tpu.memory_space<vmem>>, %arg5: memref<1x64xf32, #tpu.memory_space<vmem>>, %arg6: memref<1x64xbf16, #tpu.memory_space<vmem>>, %arg7: memref<1x1xf32, #tpu.memory_space<vmem>>, %arg8: memref<1x512xf32, #tpu.memory_space<vmem>>) attributes {dimension_semantics = [#tpu.dimension_semantics<parallel>], iteration_bounds = array<i64: 2>, scalar_prefetch = 0 : i64, scratch_operands = 0 : i64, tpu.core_type = #tpu.core_type<tc>, window_params = [{transform_indices = @transform_0, window_bounds = array<i64: 512, 32>}, {pipeline_mode = #tpu.pipeline_mode<synchronous>, transform_indices = @transform_1, window_bounds = array<i64: 32, 128>}, {pipeline_mode = #tpu.pipeline_mode<synchronous>, transform_indices = @transform_2, window_bounds = array<i64: 1, 128>}, {pipeline_mode = #tpu.pipeline_mode<synchronous>, transform_indices = @transform_3, window_bounds = array<i64: 128, 64>}, {pipeline_mode = #tpu.pipeline_mode<synchronous>, transform_indices = @transform_4, window_bounds = array<i64: 1, 64>}, {pipeline_mode = #tpu.pipeline_mode<synchronous>, transform_indices = @transform_5, window_bounds = array<i64: 1, 64>}, {pipeline_mode = #tpu.pipeline_mode<synchronous>, transform_indices = @transform_6, window_bounds = array<i64: 1, 1>}, {transform_indices = @transform_7, window_bounds = array<i64: 1, 512>}]} {
    %c0 = arith.constant 0 : index
    %c0_0 = arith.constant 0 : index
    %0 = vector.load %arg1[%c0, %c0_0] : memref<512x32xbf16, #tpu.memory_space<vmem>>, vector<512x32xbf16>
    %c0_1 = arith.constant 0 : index
    %c0_2 = arith.constant 0 : index
    %1 = vector.load %arg2[%c0_1, %c0_2] : memref<32x128xbf16, #tpu.memory_space<vmem>>, vector<32x128xbf16>
    %cst = arith.constant dense<0.000000e+00> : vector<512x128xf32>
    %2 = tpu.matmul %0, %1, %cst {dimension_numbers = #tpu.dot_dimension_numbers<[1], [0], [0], [1], [0, 0, 1, 1], [], []>} : vector<512x32xbf16>, vector<32x128xbf16>, vector<512x128xf32> -> vector<512x128xf32>
    %c0_3 = arith.constant 0 : index
    %c0_4 = arith.constant 0 : index
    %3 = vector.load %arg3[%c0_3, %c0_4] : memref<1x128xf32, #tpu.memory_space<vmem>>, vector<1x128xf32>
    %4 = vector.broadcast %3 : vector<1x128xf32> to vector<512x128xf32>
    %5 = arith.addf %2, %4 : vector<512x128xf32>
    %cst_5 = arith.constant 0.000000e+00 : f32
    %6 = vector.broadcast %cst_5 : f32 to vector<512x128xf32>
    %7 = arith.maximumf %5, %6 : vector<512x128xf32>
    %8 = arith.truncf %7 : vector<512x128xf32> to vector<512x128xbf16>
    %c0_6 = arith.constant 0 : index
    %c0_7 = arith.constant 0 : index
    %9 = vector.load %arg4[%c0_6, %c0_7] : memref<128x64xbf16, #tpu.memory_space<vmem>>, vector<128x64xbf16>
    %cst_8 = arith.constant dense<0.000000e+00> : vector<512x64xf32>
    %10 = tpu.matmul %8, %9, %cst_8 {dimension_numbers = #tpu.dot_dimension_numbers<[1], [0], [0], [1], [0, 0, 1, 1], [], []>} : vector<512x128xbf16>, vector<128x64xbf16>, vector<512x64xf32> -> vector<512x64xf32>
    %c0_9 = arith.constant 0 : index
    %c0_10 = arith.constant 0 : index
    %11 = vector.load %arg5[%c0_9, %c0_10] : memref<1x64xf32, #tpu.memory_space<vmem>>, vector<1x64xf32>
    %12 = vector.broadcast %11 : vector<1x64xf32> to vector<512x64xf32>
    %13 = arith.addf %10, %12 : vector<512x64xf32>
    %cst_11 = arith.constant 0.000000e+00 : f32
    %14 = vector.broadcast %cst_11 : f32 to vector<512x64xf32>
    %15 = arith.maximumf %13, %14 : vector<512x64xf32>
    %c0_12 = arith.constant 0 : index
    %c0_13 = arith.constant 0 : index
    %16 = vector.load %arg6[%c0_12, %c0_13] : memref<1x64xbf16, #tpu.memory_space<vmem>>, vector<1x64xbf16>
    %17 = arith.truncf %15 : vector<512x64xf32> to vector<512x64xbf16>
    %cst_14 = arith.constant dense<0.000000e+00> : vector<1x512xf32>
    %18 = tpu.matmul %16, %17, %cst_14 {dimension_numbers = #tpu.dot_dimension_numbers<[1], [1], [0], [0], [0, 0, 1, 0], [], []>} : vector<1x64xbf16>, vector<512x64xbf16>, vector<1x512xf32> -> vector<1x512xf32>
    %c0_15 = arith.constant 0 : index
    %c0_16 = arith.constant 0 : index
    %19 = vector.load %arg7[%c0_15, %c0_16] : memref<1x1xf32, #tpu.memory_space<vmem>>, vector<1x1xf32>
    %20 = vector.broadcast %19 : vector<1x1xf32> to vector<1x512xf32>
    %21 = arith.addf %18, %20 : vector<1x512xf32>
    %22 = arith.negf %21 : vector<1x512xf32>
    %23 = math.exp %22 : vector<1x512xf32>
    %cst_17 = arith.constant 1.000000e+00 : f32
    %24 = vector.broadcast %cst_17 : f32 to vector<1x512xf32>
    %25 = arith.addf %24, %23 : vector<1x512xf32>
    %26 = arith.divf %24, %25 : vector<1x512xf32>
    %c0_18 = arith.constant 0 : index
    %c0_19 = arith.constant 0 : index
    %27 = vector.load %arg8[%c0_18, %c0_19] : memref<1x512xf32, #tpu.memory_space<vmem>>, vector<1x512xf32>
    tpu.vector_store %arg8[%c0_18, %c0_19], %26 {strides = array<i32>} : memref<1x512xf32, #tpu.memory_space<vmem>>, vector<1x512xf32>,
    return
  }
  func.func @transform_0(%arg0: i32) -> (i32, i32) {
    %c0_i32 = arith.constant 0 : i32
    %c0_i32_0 = arith.constant 0 : i32
    return %arg0, %c0_i32 : i32, i32
  }
  func.func @transform_1(%arg0: i32) -> (i32, i32) {
    %c0_i32 = arith.constant 0 : i32
    %c0_i32_0 = arith.constant 0 : i32
    %c0_i32_1 = arith.constant 0 : i32
    return %c0_i32, %c0_i32_0 : i32, i32
  }
  func.func @transform_2(%arg0: i32) -> (i32, i32) {
    %c0_i32 = arith.constant 0 : i32
    %c0_i32_0 = arith.constant 0 : i32
    %c0_i32_1 = arith.constant 0 : i32
    return %c0_i32, %c0_i32_0 : i32, i32
  }
  func.func @transform_3(%arg0: i32) -> (i32, i32) {
    %c0_i32 = arith.constant 0 : i32
    %c0_i32_0 = arith.constant 0 : i32
    %c0_i32_1 = arith.constant 0 : i32
    return %c0_i32, %c0_i32_0 : i32, i32
  }
  func.func @transform_4(%arg0: i32) -> (i32, i32) {
    %c0_i32 = arith.constant 0 : i32
    %c0_i32_0 = arith.constant 0 : i32
    %c0_i32_1 = arith.constant 0 : i32
    return %c0_i32, %c0_i32_0 : i32, i32
  }
  func.func @transform_5(%arg0: i32) -> (i32, i32) {
    %c0_i32 = arith.constant 0 : i32
    %c0_i32_0 = arith.constant 0 : i32
    %c0_i32_1 = arith.constant 0 : i32
    return %c0_i32, %c0_i32_0 : i32, i32
  }
  func.func @transform_6(%arg0: i32) -> (i32, i32) {
    %c0_i32 = arith.constant 0 : i32
    %c0_i32_0 = arith.constant 0 : i32
    %c0_i32_1 = arith.constant 0 : i32
    return %c0_i32, %c0_i32_0 : i32, i32
  }
  func.func @transform_7(%arg0: i32) -> (i32, i32) {
    %c0_i32 = arith.constant 0 : i32
    %c0_i32_0 = arith.constant 0 : i32
    return %c0_i32, %arg0 : i32, i32
  }
}

</mosaic_0001>

<bundles_post_ra>
// kernel: tpu_custom_call.1
= control target key start
LH: loop header
LB: loop body
LE: loop exit
PB: predicated region body
PF: predicated region fallthrough
CT: control target
= control target key end

     0   :  { %s2801_s0 = inlined_call_operand.vmem [shape: bf16[1024,32], index: 0, kind: input, shape index: {}]   ;;  %s2802_s1 = inlined_call_operand.vmem [shape: bf16[32,128], index: 1, kind: input, shape index: {}]   ;;  %s2803_s2 = inlined_call_operand.vmem [shape: f32[1,128], index: 2, kind: input, shape index: {}]   ;;  %s2804_s3 = inlined_call_operand.vmem [shape: bf16[128,64], index: 3, kind: input, shape index: {}]   ;;  %s2805_s4 = inlined_call_operand.vmem [shape: f32[1,64], index: 4, kind: input, shape index: {}]   ;;  %s2806_s5 = inlined_call_operand.vmem [shape: bf16[1,64], index: 5, kind: input, shape index: {}]   ;;  %s2807_s6 = inlined_call_operand.<no memory space> [shape: f32[1,1], index: 6, kind: input, shape index: {}]   ;;  %s2808_s7 = inlined_call_operand.hbm [shape: f32[1,1024], index: 7, kind: output, shape index: {}]  }
   0x1   :  { %v12_v0 = vstv %s2807_s6 }
   0x2   :  { %13 = vst [vmem:[#allocation2] sm:$0x1] %v12_v0 }
   0x3   :  { %14 = vsyncpa [#allocation4], 0 }
   0x4   :  { %16 = vsyncpa [#allocation4 + $0x1], 0  ;;  %s2372_s26 = smov 0   ;;  %s2374_s27 = smov 0  }
   0x5   :  { %s2376_s28 = smov 0   ;;  %s2378_s29 = smov 0  }
   0x6 LB: > { %s1792_s6 = sadd.s32 4294967295, %s2324_s29   ;;  %s1793_s30 = sadd.s32 4294967294, %s2324_s29   ;;  %s2324_s29 = sphi %s2378_s29, %s2814_s29   ;;  %s2320_s28 = sphi %s2376_s28, %s2813_s28   ;;  %s2316_s27 = sphi %s2374_s27, %s2812_s27   ;;  %s2312_s26 = sphi %s2372_s26, %s2811_s26  }
   0x7   : > { %s2395_s8 = sadd.s32 1, %s2324_s29   ;;  %s181_s9 = sadd.s32 1, %s2320_s28 }
   0x8   : > { %s178_s10 = ssub.s32 %s2324_s29, %s2395_s8  ;;  %p191_p0 = scmp.ne.s32.totalorder %s2320_s28, %s2316_s27 }
   0x9   : > { %p179_p1 = scmp.eq.s32.totalorder %s178_s10, 0  ;;  %p192_p2 = scmp.eq.s32.totalorder %s1792_s6, 1 }
   0xa   : > { %p197_p3 = scmp.ne.s32.totalorder %s2316_s27, %s2312_s26  ;;  %p198_p4 = scmp.eq.s32.totalorder %s1793_s30, 1 }
   0xb   : > { %s2405_s11 = scalar_select %p179_p1, %s2320_s28, %s181_s9  }
   0xc   : > { %p2407_p5 = por %p192_p2, %p191_p0  ;;  %p2411_p6 = por %p198_p4, %p197_p3 }
   0xd   : > { %p1796_p7 = scmp.ge.s32.totalorder %s2324_s29, 1  ;;  %p243_p8 = scmp.lt.s32.totalorder %s2324_s29, 3 }
   0xf   : > { %p244_p9 = pnand %p1796_p7, %p243_p8 }
  0x10   : > { %v2204_v1 = vld [vmem:[%s2802_s1] sm:$0xff] (!%p244_p9)   ;;  %s2420_s16 = sshll.u32 (!%p244_p9), %s1792_s6, 6  ;;  %v2205_v2 = vld [vmem:[%s2802_s1 + $0x8] sm:$0xff] (!%p244_p9)   ;;  %vm530_vm0 = vcmask (!%p244_p9), 261120   ;;  %v2240_v5 = vld [vmem:[%s2804_s3 + $0x10] sm:$0xff] (!%p244_p9)   ;;  %vm1479_vm1 = vcmask (!%p244_p9), 523264  }
  0x11   : > { %247 = sbr.rel (%p244_p9) target bundleno = 896 (0x380), region = 48  ;;  %p276_p10 = scmp.lt.s32.totalorder (!%p244_p9), %s2420_s16, 127  ;;  %1998 = vmatprep.subr.bf16.mxu0 (!%p244_p9), %v2204_v1  ;;  %v2238_v3 = vld [vmem:[%s2804_s3] sm:$0xff] (!%p244_p9)   ;;  %v2239_v4 = vld [vmem:[%s2804_s3 + $0x8] sm:$0xff] (!%p244_p9)   ;;  %v2241_v9 = vld [vmem:[%s2804_s3 + $0x18] sm:$0xff] (!%p244_p9)  }
  0x12   : > { %1999 = vmatpush3.bf16.msra.mxu0 (!%p244_p9), %v2204_v1  ;;  %2066 = vmatprep.subr.bf16.mxu1 (!%p244_p9), %v2238_v3  ;;  %v2242_v10 = vld [vmem:[%s2804_s3 + $0x20] sm:$0xff] (!%p244_p9)   ;;  %v2243_v19 = vld [vmem:[%s2804_s3 + $0x28] sm:$0xff] (!%p244_p9)   ;;  %v2244_v33 = vld [vmem:[%s2804_s3 + $0x30] sm:$0xff] (!%p244_p9)   ;;  %s272_s15 = sand.u32 (!%p244_p9), 1, %s2316_s27   ;;  %s2759_s22 = scalar_lea.hbm (!%p244_p9), %s2808_s7, %s2420_s16 }
  0x13   : > { %2000 = vmatprep.subr.bf16.mxu0 (!%p244_p9), %v2205_v2  ;;  %2067 = vmatpush3.bf16.msra.mxu1 (!%p244_p9), %v2238_v3  ;;  %v2245_v35 = vld [vmem:[%s2804_s3 + $0x38] sm:$0xff] (!%p244_p9)   ;;  %v2523_v43 = vld [vmem:[%s2803_s2] ss:$0 sm:$0xff] (!%p244_p9)  ;;  %s1797_s17 = sshll.u32 (!%p244_p9), %s272_s15, 2  ;;  %s1720_s23 = scalar_lea.sflag (!%p244_p9), [#allocation4], %s272_s15 }
  0x14   : > { %2068 = vmatprep.subr.bf16.mxu1 (!%p244_p9), %v2239_v4  ;;  %s274_s18 = scalar_lea.vmem (!%p244_p9), [#allocation3], %s1797_s17  ;;  %s2328_s25 = smov (!%p244_p9), [#allocation3]  }
  0x15   : > { %s1734_s19 = sshll.u32 (!%p244_p9), %s274_s18, 4  ;;  %s2266_s6 = sshll.u32 (!%p244_p9), %s2328_s25, 4  ;;  %s2761_s19 = int_to_ptr.vmem [resolvable:$true] %s1734_s19  ;;  %s2267_s6 = int_to_ptr.vmem [resolvable:$false] %s2266_s6 }
  0x16   : > { %2001 = vmatpush3.bf16.msra.mxu0 (!%p244_p9), %v2205_v2  ;;  %p2269_p0 = scmp.lt.s32.totalorder (!%p244_p9), %s2761_s19, %s2267_s6 }
  0x17   : > { %2069 = vmatpush3.bf16.msra.mxu1 (!%p244_p9), %v2239_v4 }
  0x18   : > { %s277_s21 = scalar_select %p276_p10, %s2420_s16, 127  ;;  %2070 = vmatprep.subr.bf16.mxu1 %v2240_v5 }
  0x1a   : > { %s1799_s24 = sshll.u32 %s277_s21, 2 }
  0x1b   : > { %s2436_s30 = scalar_lea.vmem %s2801_s0, %s1799_s24  ;;  %2071 = vmatpush3.bf16.msra.mxu1 %v2240_v5  ;;  %s2262_s24 = scalar_lea.vmem %s2761_s19, 64 }
  0x1c   : > { %v2206_v6 = vld [vmem:[%s2436_s30] sm:$0xff]   ;;  %v2207_v7 = vld [vmem:[%s2436_s30 + $0x8] sm:$0xff]   ;;  %v2208_v8 = vld [vmem:[%s2436_s30 + $0x10] sm:$0xff]   ;;  %2072 = vmatprep.subr.bf16.mxu1 %v2241_v9  ;;  %p2263_p11 = scmp.ne.s32.totalorder %s2761_s19, %s2262_s24 }
  0x1d   : > { %2002 = vmatprep.mubr.msk.bf16.mxu0 %vm530_vm0, %v2206_v6  ;;  %v2209_v11 = vld [vmem:[%s2436_s30 + $0x18] sm:$0xff]   ;;  %v2210_v12 = vld [vmem:[%s2436_s30 + $0x20] sm:$0xff]   ;;  %v2211_v13 = vld [vmem:[%s2436_s30 + $0x28] sm:$0xff]  }
  0x1e   : > { %2003 = vmatmul.mubr.msk.bf16.vlgmr.msra.gmra.mrb[0].mxu0 %vm530_vm0, %v2207_v7  ;;  %v2212_v14 = vld [vmem:[%s2436_s30 + $0x30] sm:$0xff]   ;;  %v2213_v15 = vld [vmem:[%s2436_s30 + $0x38] sm:$0xff]   ;;  %v2214_v16 = vld [vmem:[%s2436_s30 + $0x40] sm:$0xff]   ;;  %p2264_p12 = pnand %p2263_p11, %p2407_p5 }
  0x1f   : > { %2006 = vmatprep.mubr.msk.bf16.mxu0 %vm530_vm0, %v2208_v8  ;;  %2073 = vmatpush3.bf16.msra.mxu1 %v2241_v9  ;;  %v2215_v17 = vld [vmem:[%s2436_s30 + $0x48] sm:$0xff]   ;;  %v2216_v18 = vld [vmem:[%s2436_s30 + $0x50] sm:$0xff]   ;;  %v2217_v20 = vld [vmem:[%s2436_s30 + $0x58] sm:$0xff]  }
  0x20   : > { %2074 = vmatprep.subr.bf16.mxu1 %v2242_v10  ;;  %v2218_v21 = vld [vmem:[%s2436_s30 + $0x60] sm:$0xff]   ;;  %v2219_v22 = vld [vmem:[%s2436_s30 + $0x68] sm:$0xff]   ;;  %v2220_v23 = vld [vmem:[%s2436_s30 + $0x70] sm:$0xff]   ;;  %p2265_p13 = pneg %p2264_p12 }
  0x21   : > { %v2221_v24 = vld [vmem:[%s2436_s30 + $0x78] sm:$0xff]   ;;  %v2222_v25 = vld [vmem:[%s2436_s30 + $0x80] sm:$0xff]   ;;  %v2223_v26 = vld [vmem:[%s2436_s30 + $0x88] sm:$0xff]  }
  0x22   : > { %v2224_v27 = vld [vmem:[%s2436_s30 + $0x90] sm:$0xff]   ;;  %v2225_v28 = vld [vmem:[%s2436_s30 + $0x98] sm:$0xff]   ;;  %v2226_v29 = vld [vmem:[%s2436_s30 + $0xa0] sm:$0xff]  }
  0x23   : > { %2075 = vmatpush3.bf16.msra.mxu1 %v2242_v10  ;;  %v2227_v30 = vld [vmem:[%s2436_s30 + $0xa8] sm:$0xff]   ;;  %v2228_v31 = vld [vmem:[%s2436_s30 + $0xb0] sm:$0xff]   ;;  %v2229_v32 = vld [vmem:[%s2436_s30 + $0xb8] sm:$0xff]  }
  0x24   : > { %2076 = vmatprep.subr.bf16.mxu1 %v2243_v19  ;;  %v2230_v34 = vld [vmem:[%s2436_s30 + $0xc0] sm:$0xff]   ;;  %v2231_v36 = vld [vmem:[%s2436_s30 + $0xc8] sm:$0xff]   ;;  %v2232_v37 = vld [vmem:[%s2436_s30 + $0xd0] sm:$0xff]  }
  0x25   : > { %v2233_v38 = vld [vmem:[%s2436_s30 + $0xd8] sm:$0xff]   ;;  %v2234_v39 = vld [vmem:[%s2436_s30 + $0xe0] sm:$0xff]   ;;  %v2235_v40 = vld [vmem:[%s2436_s30 + $0xe8] sm:$0xff]  }
  0x26   : > { %2007 = vmatmul.mubr.msk.bf16.gmra.mrb[4].mxu0 %vm530_vm0, %v2209_v11  ;;  %v2236_v41 = vld [vmem:[%s2436_s30 + $0xf0] sm:$0xff]   ;;  %v2237_v42 = vld [vmem:[%s2436_s30 + $0xf8] sm:$0xff]   ;;  %s2268_s30 = scalar_lea.vmem %s2267_s6, 128 }
  0x27   : > { %2010 = vmatprep.mubr.msk.bf16.mxu0 %vm530_vm0, %v2210_v12  ;;  %2077 = vmatpush3.bf16.msra.mxu1 %v2243_v19  ;;  %p2270_p1 = scmp.lt.s32.totalorder %s2268_s30, %s2262_s24 }
  0x28   : > { %2078 = vmatprep.subr.bf16.mxu1 %v2244_v33 }
  0x29   : > { %p2271_p2 = por %p2270_p1, %p2269_p0 }
  0x2b   : > { %2079 = vmatpush3.bf16.msra.mxu1 %v2244_v33  ;;  %p2272_p3 = pnand %p2271_p2, %p2265_p13 }
  0x2c   : > { %2080 = vmatprep.subr.bf16.mxu1 %v2245_v35 }
  0x2e   : > { %2011 = vmatmul.mubr.msk.bf16.gmra.mrb[8].mxu0 %vm530_vm0, %v2211_v13 }
  0x2f   : > { %2014 = vmatprep.mubr.msk.bf16.mxu0 %vm530_vm0, %v2212_v14  ;;  %2081 = vmatpush3.bf16.msra.mxu1 %v2245_v35 }
  0x36   : > { %2015 = vmatmul.mubr.msk.bf16.gmra.mrb[12].mxu0 %vm530_vm0, %v2213_v15 }
  0x37   : > { %2018 = vmatprep.mubr.msk.bf16.mxu0 %vm530_vm0, %v2214_v16 }
  0x3e   : > { %2019 = vmatmul.mubr.msk.bf16.gmra.mrb[16].mxu0 %vm530_vm0, %v2215_v17 }
  0x3f   : > { %2022 = vmatprep.mubr.msk.bf16.mxu0 %vm530_vm0, %v2216_v18 }
  0x46   : > { %2023 = vmatmul.mubr.msk.bf16.gmra.mrb[20].mxu0 %vm530_vm0, %v2217_v20 }
  0x47   : > { %2026 = vmatprep.mubr.msk.bf16.mxu0 %vm530_vm0, %v2218_v21 }
  0x4e   : > { %2027 = vmatmul.mubr.msk.bf16.gmra.mrb[24].mxu0 %vm530_vm0, %v2219_v22 }
  0x4f   : > { %2030 = vmatprep.mubr.msk.bf16.mxu0 %vm530_vm0, %v2220_v23 }
  0x56   : > { %2031 = vmatmul.mubr.msk.bf16.gmra.mrb[28].mxu0 %vm530_vm0, %v2221_v24 }
  0x57   : > { %2034 = vmatprep.mubr.msk.bf16.mxu0 %vm530_vm0, %v2222_v25 }
  0x5e   : > { %2035 = vmatmul.mubr.msk.bf16.gmra.mrb[32].mxu0 %vm530_vm0, %v2223_v26 }
  0x5f   : > { %2038 = vmatprep.mubr.msk.bf16.mxu0 %vm530_vm0, %v2224_v27 }
  0x66   : > { %2039 = vmatmul.mubr.msk.bf16.gmra.mrb[36].mxu0 %vm530_vm0, %v2225_v28 }
  0x67   : > { %2042 = vmatprep.mubr.msk.bf16.mxu0 %vm530_vm0, %v2226_v29 }
  0x6e   : > { %2043 = vmatmul.mubr.msk.bf16.gmra.mrb[40].mxu0 %vm530_vm0, %v2227_v30 }
  0x6f   : > { %2046 = vmatprep.mubr.msk.bf16.mxu0 %vm530_vm0, %v2228_v31 }
  0x76   : > { %2047 = vmatmul.mubr.msk.bf16.gmra.mrb[44].mxu0 %vm530_vm0, %v2229_v32 }
  0x77   : > { %2050 = vmatprep.mubr.msk.bf16.mxu0 %vm530_vm0, %v2230_v34 }
  0x7e   : > { %2051 = vmatmul.mubr.msk.bf16.gmra.mrb[48].mxu0 %vm530_vm0, %v2231_v36 }
  0x7f   : > { %2054 = vmatprep.mubr.msk.bf16.mxu0 %vm530_vm0, %v2232_v37 }
  0x86   : > { %2055 = vmatmul.mubr.msk.bf16.gmra.mrb[52].mxu0 %vm530_vm0, %v2233_v38 }
  0x87   : > { %2058 = vmatprep.mubr.msk.bf16.mxu0 %vm530_vm0, %v2234_v39 }
  0x8e   : > { %2059 = vmatmul.mubr.msk.bf16.gmra.mrb[56].mxu0 %vm530_vm0, %v2235_v40 }
  0x8f   : > { %2062 = vmatprep.mubr.msk.bf16.mxu0 %vm530_vm0, %v2236_v41 }
  0x96   : > { %2063 = vmatmul.mubr.msk.bf16.gmra.mrb[60].mxu0 %vm530_vm0, %v2237_v42 }
  0xf1   : > { %v2004_v44 = vpop.f32.mrb[0].mxu0 }
  0xf2   : > { %v670_v45 = vadd.f32 %v2004_v44, %v2523_v43  ;;  %v661_v46 = vpop.f32.mrb[1].mxu0 }
  0xf3   : > { %v662_v47 = vadd.f32 %v2523_v43, %v661_v46  ;;  %v2005_v48 = vpop.f32.mrb[2].mxu0 }
  0xf4   : > { %v673_v49 = vadd.f32 %v2005_v48, %v2523_v43  ;;  %v664_v50 = vpop.f32.mrb[3].mxu0  ;;  %v918_v52 = vmax.f32 %v670_v45, 0.0 }
  0xf5   : > { %v665_v51 = vadd.f32 %v2523_v43, %v664_v50  ;;  %v916_v54 = vmax.f32 %v662_v47, 0.0 }
  0xf6   : > { %v919_v53 = vmax.f32 %v673_v49, 0.0 }
  0xf7   : > { %v917_v55 = vmax.f32 %v665_v51, 0.0 }
  0xf8   : > { %v981_v56 = vpack.c.bf16 %v919_v53, %v918_v52 }
  0xf9   : > { %v2008_v57 = vpop.f32.mrb[4].mxu0  ;;  %v980_v58 = vpack.c.bf16 %v917_v55, %v916_v54 }
  0xfa   : > { %v686_v59 = vadd.f32 %v2008_v57, %v2523_v43  ;;  %v677_v60 = vpop.f32.mrb[5].mxu0 }
  0xfb   : > { %v678_v61 = vadd.f32 %v2523_v43, %v677_v60  ;;  %v2009_v62 = vpop.f32.mrb[6].mxu0  ;;  %2082 = vmatprep.mubr.bf16.mxu1 %v980_v58 }
  0xfc   : > { %v689_v63 = vadd.f32 %v2009_v62, %v2523_v43  ;;  %v680_v0 = vpop.f32.mrb[7].mxu0  ;;  %2083 = vmatmul.mubr.bf16.vlgmr.msra.gmra.mrb[0].mxu1 %v981_v56  ;;  %v922_v2 = vmax.f32 %v686_v59, 0.0 }
  0xfd   : > { %v681_v1 = vadd.f32 %v2523_v43, %v680_v0  ;;  %v920_v4 = vmax.f32 %v678_v61, 0.0 }
  0xfe   : > { %v923_v3 = vmax.f32 %v689_v63, 0.0 }
  0xff   : > { %v921_v5 = vmax.f32 %v681_v1, 0.0 }
 0x100   : > { %v983_v6 = vpack.c.bf16 %v923_v3, %v922_v2 }
 0x101   : > { %v982_v7 = vpack.c.bf16 %v921_v5, %v920_v4  ;;  %v2012_v8 = vpop.f32.mrb[8].mxu0 }
 0x102   : > { %v702_v9 = vadd.f32 %v2012_v8, %v2523_v43  ;;  %v693_v10 = vpop.f32.mrb[9].mxu0 }
 0x103   : > { %v694_v11 = vadd.f32 %v2523_v43, %v693_v10  ;;  %v2013_v12 = vpop.f32.mrb[10].mxu0  ;;  %2086 = vmatprep.mubr.bf16.mxu1 %v982_v7 }
 0x104   : > { %v705_v13 = vadd.f32 %v2013_v12, %v2523_v43  ;;  %v696_v14 = vpop.f32.mrb[11].mxu0  ;;  %2087 = vmatmul.mubr.bf16.gmra.mrb[4].mxu1 %v983_v6  ;;  %v926_v16 = vmax.f32 %v702_v9, 0.0 }
 0x105   : > { %v697_v15 = vadd.f32 %v2523_v43, %v696_v14  ;;  %v924_v18 = vmax.f32 %v694_v11, 0.0 }
 0x106   : > { %v927_v17 = vmax.f32 %v705_v13, 0.0 }
 0x107   : > { %v925_v19 = vmax.f32 %v697_v15, 0.0 }
 0x108   : > { %v985_v20 = vpack.c.bf16 %v927_v17, %v926_v16 }
 0x109   : > { %v984_v21 = vpack.c.bf16 %v925_v19, %v924_v18  ;;  %v2016_v22 = vpop.f32.mrb[12].mxu0 }
 0x10a   : > { %v718_v23 = vadd.f32 %v2016_v22, %v2523_v43  ;;  %v709_v24 = vpop.f32.mrb[13].mxu0 }
 0x10b   : > { %v710_v25 = vadd.f32 %v2523_v43, %v709_v24  ;;  %v2017_v26 = vpop.f32.mrb[14].mxu0  ;;  %2090 = vmatprep.mubr.bf16.mxu1 %v984_v21 }
 0x10c   : > { %v721_v27 = vadd.f32 %v2017_v26, %v2523_v43  ;;  %v712_v28 = vpop.f32.mrb[15].mxu0  ;;  %2091 = vmatmul.mubr.bf16.gmra.mrb[8].mxu1 %v985_v20  ;;  %v930_v30 = vmax.f32 %v718_v23, 0.0 }
 0x10d   : > { %v713_v29 = vadd.f32 %v2523_v43, %v712_v28  ;;  %v928_v32 = vmax.f32 %v710_v25, 0.0 }
 0x10e   : > { %v931_v31 = vmax.f32 %v721_v27, 0.0 }
 0x10f   : > { %v929_v33 = vmax.f32 %v713_v29, 0.0 }
 0x110   : > { %v987_v34 = vpack.c.bf16 %v931_v31, %v930_v30 }
 0x111   : > { %v986_v35 = vpack.c.bf16 %v929_v33, %v928_v32  ;;  %v2020_v36 = vpop.f32.mrb[16].mxu0 }
 0x112   : > { %v734_v37 = vadd.f32 %v2020_v36, %v2523_v43  ;;  %v725_v38 = vpop.f32.mrb[17].mxu0 }
 0x113   : > { %v726_v39 = vadd.f32 %v2523_v43, %v725_v38  ;;  %v2021_v40 = vpop.f32.mrb[18].mxu0  ;;  %2094 = vmatprep.mubr.bf16.mxu1 %v986_v35 }
 0x114   : > { %v737_v41 = vadd.f32 %v2021_v40, %v2523_v43  ;;  %v728_v42 = vpop.f32.mrb[19].mxu0  ;;  %2095 = vmatmul.mubr.bf16.gmra.mrb[12].mxu1 %v987_v34  ;;  %v934_v45 = vmax.f32 %v734_v37, 0.0 }
 0x115   : > { %v729_v44 = vadd.f32 %v2523_v43, %v728_v42  ;;  %v932_v47 = vmax.f32 %v726_v39, 0.0 }
 0x116   : > { %v935_v46 = vmax.f32 %v737_v41, 0.0 }
 0x117   : > { %v933_v48 = vmax.f32 %v729_v44, 0.0 }
 0x118   : > { %v989_v49 = vpack.c.bf16 %v935_v46, %v934_v45 }
 0x119   : > { %v988_v50 = vpack.c.bf16 %v933_v48, %v932_v47  ;;  %v2024_v51 = vpop.f32.mrb[20].mxu0 }
 0x11a   : > { %v750_v52 = vadd.f32 %v2024_v51, %v2523_v43  ;;  %v741_v53 = vpop.f32.mrb[21].mxu0 }
 0x11b   : > { %v742_v54 = vadd.f32 %v2523_v43, %v741_v53  ;;  %v2025_v55 = vpop.f32.mrb[22].mxu0  ;;  %2098 = vmatprep.mubr.bf16.mxu1 %v988_v50 }
 0x11c   : > { %v753_v56 = vadd.f32 %v2025_v55, %v2523_v43  ;;  %v744_v57 = vpop.f32.mrb[23].mxu0  ;;  %2099 = vmatmul.mubr.bf16.gmra.mrb[16].mxu1 %v989_v49  ;;  %v938_v59 = vmax.f32 %v750_v52, 0.0 }
 0x11d   : > { %v745_v58 = vadd.f32 %v2523_v43, %v744_v57  ;;  %v936_v61 = vmax.f32 %v742_v54, 0.0 }
 0x11e   : > { %v939_v60 = vmax.f32 %v753_v56, 0.0 }
 0x11f   : > { %v937_v62 = vmax.f32 %v745_v58, 0.0 }
 0x120   : > { %v991_v63 = vpack.c.bf16 %v939_v60, %v938_v59 }
 0x121   : > { %v990_v0 = vpack.c.bf16 %v937_v62, %v936_v61  ;;  %v2028_v1 = vpop.f32.mrb[24].mxu0 }
 0x122   : > { %v766_v2 = vadd.f32 %v2028_v1, %v2523_v43  ;;  %v757_v3 = vpop.f32.mrb[25].mxu0 }
 0x123   : > { %v758_v4 = vadd.f32 %v2523_v43, %v757_v3  ;;  %v2029_v5 = vpop.f32.mrb[26].mxu0  ;;  %2102 = vmatprep.mubr.bf16.mxu1 %v990_v0 }
 0x124   : > { %v769_v6 = vadd.f32 %v2029_v5, %v2523_v43  ;;  %v760_v7 = vpop.f32.mrb[27].mxu0  ;;  %2103 = vmatmul.mubr.bf16.gmra.mrb[20].mxu1 %v991_v63  ;;  %v942_v9 = vmax.f32 %v766_v2, 0.0 }
 0x125   : > { %v761_v8 = vadd.f32 %v2523_v43, %v760_v7  ;;  %v940_v11 = vmax.f32 %v758_v4, 0.0 }
 0x126   : > { %v943_v10 = vmax.f32 %v769_v6, 0.0 }
 0x127   : > { %v941_v12 = vmax.f32 %v761_v8, 0.0 }
 0x128   : > { %v993_v13 = vpack.c.bf16 %v943_v10, %v942_v9 }
 0x129   : > { %v992_v14 = vpack.c.bf16 %v941_v12, %v940_v11  ;;  %v2032_v15 = vpop.f32.mrb[28].mxu0 }
 0x12a   : > { %v782_v16 = vadd.f32 %v2032_v15, %v2523_v43  ;;  %v773_v17 = vpop.f32.mrb[29].mxu0 }
 0x12b   : > { %v774_v18 = vadd.f32 %v2523_v43, %v773_v17  ;;  %v2033_v19 = vpop.f32.mrb[30].mxu0  ;;  %2106 = vmatprep.mubr.bf16.mxu1 %v992_v14 }
 0x12c   : > { %v785_v20 = vadd.f32 %v2033_v19, %v2523_v43  ;;  %v776_v21 = vpop.f32.mrb[31].mxu0  ;;  %2107 = vmatmul.mubr.bf16.gmra.mrb[24].mxu1 %v993_v13  ;;  %v946_v23 = vmax.f32 %v782_v16, 0.0 }
 0x12d   : > { %v777_v22 = vadd.f32 %v2523_v43, %v776_v21  ;;  %v944_v25 = vmax.f32 %v774_v18, 0.0 }
 0x12e   : > { %v947_v24 = vmax.f32 %v785_v20, 0.0 }
 0x12f   : > { %v945_v26 = vmax.f32 %v777_v22, 0.0 }
 0x130   : > { %v995_v27 = vpack.c.bf16 %v947_v24, %v946_v23 }
 0x131   : > { %v994_v28 = vpack.c.bf16 %v945_v26, %v944_v25  ;;  %v2036_v29 = vpop.f32.mrb[32].mxu0 }
 0x132   : > { %v798_v30 = vadd.f32 %v2036_v29, %v2523_v43  ;;  %v789_v31 = vpop.f32.mrb[33].mxu0 }
 0x133   : > { %v790_v32 = vadd.f32 %v2523_v43, %v789_v31  ;;  %v2037_v33 = vpop.f32.mrb[34].mxu0  ;;  %2110 = vmatprep.mubr.bf16.mxu1 %v994_v28 }
 0x134   : > { %v801_v34 = vadd.f32 %v2037_v33, %v2523_v43  ;;  %v792_v35 = vpop.f32.mrb[35].mxu0  ;;  %2111 = vmatmul.mubr.bf16.gmra.mrb[28].mxu1 %v995_v27  ;;  %v950_v37 = vmax.f32 %v798_v30, 0.0 }
 0x135   : > { %v793_v36 = vadd.f32 %v2523_v43, %v792_v35  ;;  %v948_v39 = vmax.f32 %v790_v32, 0.0 }
 0x136   : > { %v951_v38 = vmax.f32 %v801_v34, 0.0 }
 0x137   : > { %v949_v40 = vmax.f32 %v793_v36, 0.0 }
 0x138   : > { %v997_v41 = vpack.c.bf16 %v951_v38, %v950_v37 }
 0x139   : > { %v996_v42 = vpack.c.bf16 %v949_v40, %v948_v39  ;;  %v2040_v44 = vpop.f32.mrb[36].mxu0 }
 0x13a   : > { %v814_v45 = vadd.f32 %v2040_v44, %v2523_v43  ;;  %v805_v46 = vpop.f32.mrb[37].mxu0 }
 0x13b   : > { %v806_v47 = vadd.f32 %v2523_v43, %v805_v46  ;;  %v2041_v48 = vpop.f32.mrb[38].mxu0  ;;  %2114 = vmatprep.mubr.bf16.mxu1 %v996_v42 }
 0x13c   : > { %v817_v49 = vadd.f32 %v2041_v48, %v2523_v43  ;;  %v808_v50 = vpop.f32.mrb[39].mxu0  ;;  %2115 = vmatmul.mubr.bf16.gmra.mrb[32].mxu1 %v997_v41  ;;  %v954_v52 = vmax.f32 %v814_v45, 0.0 }
 0x13d   : > { %v809_v51 = vadd.f32 %v2523_v43, %v808_v50  ;;  %v952_v54 = vmax.f32 %v806_v47, 0.0 }
 0x13e   : > { %v955_v53 = vmax.f32 %v817_v49, 0.0 }
 0x13f   : > { %v953_v55 = vmax.f32 %v809_v51, 0.0 }
 0x140   : > { %v999_v56 = vpack.c.bf16 %v955_v53, %v954_v52 }
 0x141   : > { %v998_v57 = vpack.c.bf16 %v953_v55, %v952_v54  ;;  %v2044_v58 = vpop.f32.mrb[40].mxu0 }
 0x142   : > { %v830_v59 = vadd.f32 %v2044_v58, %v2523_v43  ;;  %v821_v60 = vpop.f32.mrb[41].mxu0 }
 0x143   : > { %v822_v61 = vadd.f32 %v2523_v43, %v821_v60  ;;  %v2045_v62 = vpop.f32.mrb[42].mxu0  ;;  %2118 = vmatprep.mubr.bf16.mxu1 %v998_v57 }
 0x144   : > { %v833_v63 = vadd.f32 %v2045_v62, %v2523_v43  ;;  %v824_v0 = vpop.f32.mrb[43].mxu0  ;;  %2119 = vmatmul.mubr.bf16.gmra.mrb[36].mxu1 %v999_v56  ;;  %v958_v2 = vmax.f32 %v830_v59, 0.0 }
 0x145   : > { %v825_v1 = vadd.f32 %v2523_v43, %v824_v0  ;;  %v956_v4 = vmax.f32 %v822_v61, 0.0 }
 0x146   : > { %v959_v3 = vmax.f32 %v833_v63, 0.0 }
 0x147   : > { %v957_v5 = vmax.f32 %v825_v1, 0.0 }
 0x148   : > { %v1001_v6 = vpack.c.bf16 %v959_v3, %v958_v2 }
 0x149   : > { %v1000_v7 = vpack.c.bf16 %v957_v5, %v956_v4  ;;  %v2048_v8 = vpop.f32.mrb[44].mxu0 }
 0x14a   : > { %v846_v9 = vadd.f32 %v2048_v8, %v2523_v43  ;;  %v837_v10 = vpop.f32.mrb[45].mxu0 }
 0x14b   : > { %v838_v11 = vadd.f32 %v2523_v43, %v837_v10  ;;  %v2049_v12 = vpop.f32.mrb[46].mxu0  ;;  %2122 = vmatprep.mubr.bf16.mxu1 %v1000_v7 }
 0x14c   : > { %v849_v13 = vadd.f32 %v2049_v12, %v2523_v43  ;;  %v840_v14 = vpop.f32.mrb[47].mxu0  ;;  %2123 = vmatmul.mubr.bf16.gmra.mrb[40].mxu1 %v1001_v6  ;;  %v962_v16 = vmax.f32 %v846_v9, 0.0 }
 0x14d   : > { %v841_v15 = vadd.f32 %v2523_v43, %v840_v14  ;;  %v960_v18 = vmax.f32 %v838_v11, 0.0 }
 0x14e   : > { %v963_v17 = vmax.f32 %v849_v13, 0.0 }
 0x14f   : > { %v961_v19 = vmax.f32 %v841_v15, 0.0  ;;  %v2592_v15 = vld [vmem:[%s2805_s4] ss:$0 sm:$0xff] }
 0x150   : > { %v1003_v20 = vpack.c.bf16 %v963_v17, %v962_v16 }
 0x151   : > { %v1002_v21 = vpack.c.bf16 %v961_v19, %v960_v18  ;;  %v2052_v22 = vpop.f32.mrb[48].mxu0 }
 0x152   : > { %v862_v23 = vadd.f32 %v2052_v22, %v2523_v43  ;;  %v853_v24 = vpop.f32.mrb[49].mxu0 }
 0x153   : > { %v854_v25 = vadd.f32 %v2523_v43, %v853_v24  ;;  %v2053_v26 = vpop.f32.mrb[50].mxu0  ;;  %2126 = vmatprep.mubr.bf16.mxu1 %v1002_v21 }
 0x154   : > { %v865_v27 = vadd.f32 %v2053_v26, %v2523_v43  ;;  %v856_v28 = vpop.f32.mrb[51].mxu0  ;;  %2127 = vmatmul.mubr.bf16.gmra.mrb[44].mxu1 %v1003_v20  ;;  %v966_v30 = vmax.f32 %v862_v23, 0.0 }
 0x155   : > { %v857_v29 = vadd.f32 %v2523_v43, %v856_v28  ;;  %v964_v32 = vmax.f32 %v854_v25, 0.0 }
 0x156   : > { %v967_v31 = vmax.f32 %v865_v27, 0.0 }
 0x157   : > { %v965_v33 = vmax.f32 %v857_v29, 0.0 }
 0x158   : > { %v1005_v34 = vpack.c.bf16 %v967_v31, %v966_v30 }
 0x159   : > { %v1004_v35 = vpack.c.bf16 %v965_v33, %v964_v32  ;;  %v2056_v36 = vpop.f32.mrb[52].mxu0 }
 0x15a   : > { %v878_v37 = vadd.f32 %v2056_v36, %v2523_v43  ;;  %v869_v38 = vpop.f32.mrb[53].mxu0 }
 0x15b   : > { %2130 = vmatprep.mubr.bf16.mxu1 %v1004_v35  ;;  %v870_v39 = vadd.f32 %v2523_v43, %v869_v38  ;;  %v2057_v40 = vpop.f32.mrb[54].mxu0 }
 0x15c   : > { %2131 = vmatmul.mubr.bf16.gmra.mrb[48].mxu1 %v1005_v34  ;;  %v970_v41 = vmax.f32 %v878_v37, 0.0  ;;  %v881_v42 = vadd.f32 %v2057_v40, %v2523_v43  ;;  %v872_v44 = vpop.f32.mrb[55].mxu0 }
 0x15d   : > { %v968_v45 = vmax.f32 %v870_v39, 0.0  ;;  %v873_v46 = vadd.f32 %v2523_v43, %v872_v44 }
 0x15e   : > { %v971_v47 = vmax.f32 %v881_v42, 0.0 }
 0x15f   : > { %v969_v48 = vmax.f32 %v873_v46, 0.0 }
 0x160   : > { %v1007_v49 = vpack.c.bf16 %v971_v47, %v970_v41 }
 0x161   : > { %v1006_v50 = vpack.c.bf16 %v969_v48, %v968_v45  ;;  %v2060_v51 = vpop.f32.mrb[56].mxu0 }
 0x162   : > { %v894_v52 = vadd.f32 %v2060_v51, %v2523_v43  ;;  %v885_v53 = vpop.f32.mrb[57].mxu0 }
 0x163   : > { %2134 = vmatprep.mubr.bf16.mxu1 %v1006_v50  ;;  %v886_v54 = vadd.f32 %v2523_v43, %v885_v53  ;;  %v2061_v55 = vpop.f32.mrb[58].mxu0 }
 0x164   : > { %2135 = vmatmul.mubr.bf16.gmra.mrb[52].mxu1 %v1007_v49  ;;  %v974_v56 = vmax.f32 %v894_v52, 0.0  ;;  %v897_v57 = vadd.f32 %v2061_v55, %v2523_v43  ;;  %v888_v58 = vpop.f32.mrb[59].mxu0 }
 0x165   : > { %v972_v59 = vmax.f32 %v886_v54, 0.0  ;;  %v889_v60 = vadd.f32 %v2523_v43, %v888_v58 }
 0x166   : > { %v975_v61 = vmax.f32 %v897_v57, 0.0 }
 0x167   : > { %v973_v62 = vmax.f32 %v889_v60, 0.0 }
 0x168   : > { %v1009_v63 = vpack.c.bf16 %v975_v61, %v974_v56 }
 0x169   : > { %v1008_v0 = vpack.c.bf16 %v973_v62, %v972_v59  ;;  %v2064_v1 = vpop.f32.mrb[60].mxu0 }
 0x16a   : > { %v910_v2 = vadd.f32 %v2064_v1, %v2523_v43  ;;  %v901_v3 = vpop.f32.mrb[61].mxu0 }
 0x16b   : > { %2138 = vmatprep.mubr.bf16.mxu1 %v1008_v0  ;;  %v902_v4 = vadd.f32 %v2523_v43, %v901_v3  ;;  %v2065_v5 = vpop.f32.mrb[62].mxu0 }
 0x16c   : > { %2139 = vmatmul.mubr.bf16.gmra.mrb[56].mxu1 %v1009_v63  ;;  %v978_v6 = vmax.f32 %v910_v2, 0.0  ;;  %v913_v7 = vadd.f32 %v2065_v5, %v2523_v43  ;;  %v904_v8 = vpop.f32.mrb[63].mxu0 }
 0x16d   : > { %v976_v9 = vmax.f32 %v902_v4, 0.0  ;;  %v905_v10 = vadd.f32 %v2523_v43, %v904_v8 }
 0x16e   : > { %v979_v11 = vmax.f32 %v913_v7, 0.0 }
 0x16f   : > { %v977_v12 = vmax.f32 %v905_v10, 0.0 }
 0x170   : > { %v1011_v13 = vpack.c.bf16 %v979_v11, %v978_v6 }
 0x171   : > { %v1010_v14 = vpack.c.bf16 %v977_v12, %v976_v9 }
 0x173   : > { %2142 = vmatprep.mubr.bf16.mxu1 %v1010_v14 }
 0x174   : > { %2143 = vmatmul.mubr.bf16.gmra.mrb[60].mxu1 %v1011_v13 }
 0x1cf   : > { %v2084_v16 = vpop.f32.mrb[0].mxu1 }
 0x1d0   : > { %v1126_v17 = vadd.f32 %v2084_v16, %v2592_v15  ;;  %v1117_v18 = vpop.f32.mrb[1].mxu1  ;;  %v2632_v16 = vld [vmem:[%s2806_s5] sm:$0x1] }
 0x1d1   : > { %v1118_v19 = vadd.f32 %v2592_v15, %v1117_v18  ;;  %v2085_v20 = vpop.f32.mrb[2].mxu1  ;;  %1978 = vmatprep.mubr.msk.bf16.mxu0 %vm1479_vm1, %v2632_v16  ;;  %1996 = vmatprep.mubr.msk.bf16.mxu1 %vm1479_vm1, %v2632_v16 }
 0x1d2   : > { %v1129_v43 = vadd.f32 %v2085_v20, %v2592_v15  ;;  %v1120_v21 = vpop.f32.mrb[3].mxu1  ;;  %v1374_v23 = vmax.f32 %v1126_v17, 0.0 }
 0x1d3   : > { %v1121_v22 = vadd.f32 %v2592_v15, %v1120_v21  ;;  %v1372_v25 = vmax.f32 %v1118_v19, 0.0 }
 0x1d4   : > { %v1375_v24 = vmax.f32 %v1129_v43, 0.0 }
 0x1d5   : > { %v1373_v26 = vmax.f32 %v1121_v22, 0.0 }
 0x1d6   : > { %v2598_v27 = vpack.c.bf16 %v1375_v24, %v1374_v23 }
 0x1d7   : > { %v2600_v28 = vpack.c.bf16 %v1373_v26, %v1372_v25  ;;  %v2088_v29 = vpop.f32.mrb[4].mxu1 }
 0x1d8   : > { %v1142_v30 = vadd.f32 %v2088_v29, %v2592_v15  ;;  %v1133_v31 = vpop.f32.mrb[5].mxu1 }
 0x1d9   : > { %v1134_v32 = vadd.f32 %v2592_v15, %v1133_v31  ;;  %v2089_v33 = vpop.f32.mrb[6].mxu1  ;;  %v1469_v31 = vld [vmem:[#allocation2] sm:$0x1] }
 0x1da   : > { %v1145_v34 = vadd.f32 %v2089_v33, %v2592_v15  ;;  %v1136_v35 = vpop.f32.mrb[7].mxu1  ;;  %v1378_v37 = vmax.f32 %v1142_v30, 0.0  ;;  %v1484_v30 = vsel %vm1479_vm1, %v2600_v28, 0 }
 0x1db   : > { %v1137_v36 = vadd.f32 %v2592_v15, %v1136_v35  ;;  %v1376_v39 = vmax.f32 %v1134_v32, 0.0 }
 0x1dc   : > { %v1379_v38 = vmax.f32 %v1145_v34, 0.0  ;;  %v2326_v34 = vmov 0  }
 0x1dd   : > { %v1377_v40 = vmax.f32 %v1137_v36, 0.0  ;;  %2203 = vset.pattern.permute.xlu0 %v2326_v34 }
 0x1de   : > { %v2606_v41 = vpack.c.bf16 %v1379_v38, %v1378_v37  ;;  %1472 = vperm.xlu0 %2203, %v1469_v31  }
 0x1df   : > { %v2608_v42 = vpack.c.bf16 %v1377_v40, %v1376_v39  ;;  %v2092_v44 = vpop.f32.mrb[8].mxu1 }
 0x1e0   : > { %v1158_v45 = vadd.f32 %v2092_v44, %v2592_v15  ;;  %v1149_v46 = vpop.f32.mrb[9].mxu1 }
 0x1e1   : > { %v1150_v47 = vadd.f32 %v2592_v15, %v1149_v46  ;;  %v2093_v48 = vpop.f32.mrb[10].mxu1 }
 0x1e2   : > { %v1161_v49 = vadd.f32 %v2093_v48, %v2592_v15  ;;  %v1152_v50 = vpop.f32.mrb[11].mxu1  ;;  %v1382_v52 = vmax.f32 %v1158_v45, 0.0 }
 0x1e3   : > { %v1153_v51 = vadd.f32 %v2592_v15, %v1152_v50  ;;  %v1380_v54 = vmax.f32 %v1150_v47, 0.0 }
 0x1e4   : > { %v1383_v53 = vmax.f32 %v1161_v49, 0.0  ;;  %v1487_v49 = vsel %vm1479_vm1, %v2598_v27, 0 }
 0x1e5   : > { %v1381_v55 = vmax.f32 %v1153_v51, 0.0 }
 0x1e6   : > { %v2614_v56 = vpack.c.bf16 %v1383_v53, %v1382_v52 }
 0x1e7   : > { %v2616_v57 = vpack.c.bf16 %v1381_v55, %v1380_v54  ;;  %v2096_v58 = vpop.f32.mrb[12].mxu1 }
 0x1e8   : > { %v1174_v59 = vadd.f32 %v2096_v58, %v2592_v15  ;;  %v1165_v60 = vpop.f32.mrb[13].mxu1 }
 0x1e9   : > { %v1166_v61 = vadd.f32 %v2592_v15, %v1165_v60  ;;  %v2097_v62 = vpop.f32.mrb[14].mxu1  ;;  %v1496_v34 = vsel %vm1479_vm1, %v2616_v57, 0 }
 0x1ea   : > { %v1177_v63 = vadd.f32 %v2097_v62, %v2592_v15  ;;  %v1168_v0 = vpop.f32.mrb[15].mxu1  ;;  %v1386_v2 = vmax.f32 %v1174_v59, 0.0 }
 0x1eb   : > { %v1169_v1 = vadd.f32 %v2592_v15, %v1168_v0  ;;  %v1384_v4 = vmax.f32 %v1166_v61, 0.0 }
 0x1ec   : > { %v1387_v3 = vmax.f32 %v1177_v63, 0.0 }
 0x1ed   : > { %v1385_v5 = vmax.f32 %v1169_v1, 0.0  ;;  %v1490_v1 = vsel %vm1479_vm1, %v2608_v42, 0 }
 0x1ee   : > { %v2622_v6 = vpack.c.bf16 %v1387_v3, %v1386_v2 }
 0x1ef   : > { %v2624_v7 = vpack.c.bf16 %v1385_v5, %v1384_v4  ;;  %v2100_v8 = vpop.f32.mrb[16].mxu1 }
 0x1f0   : > { %v1190_v9 = vadd.f32 %v2100_v8, %v2592_v15  ;;  %v1181_v10 = vpop.f32.mrb[17].mxu1 }
 0x1f1   : > { %v1182_v11 = vadd.f32 %v2592_v15, %v1181_v10  ;;  %v2101_v12 = vpop.f32.mrb[18].mxu1 }
 0x1f2   : > { %v1193_v13 = vadd.f32 %v2101_v12, %v2592_v15  ;;  %v1184_v14 = vpop.f32.mrb[19].mxu1  ;;  %v1390_v18 = vmax.f32 %v1190_v9, 0.0 }
 0x1f3   : > { %v1185_v17 = vadd.f32 %v2592_v15, %v1184_v14  ;;  %v1388_v20 = vmax.f32 %v1182_v11, 0.0 }
 0x1f4   : > { %v1391_v19 = vmax.f32 %v1193_v13, 0.0 }
 0x1f5   : > { %v1389_v43 = vmax.f32 %v1185_v17, 0.0 }
 0x1f6   : > { %v1446_v21 = vpack.c.bf16 %v1391_v19, %v1390_v18  ;;  %v1493_v19 = vsel %vm1479_vm1, %v2606_v41, 0 }
 0x1f7   : > { %v1445_v22 = vpack.c.bf16 %v1389_v43, %v1388_v20  ;;  %v2104_v23 = vpop.f32.mrb[20].mxu1 }
 0x1f8   : > { %v1206_v24 = vadd.f32 %v2104_v23, %v2592_v15  ;;  %v1197_v25 = vpop.f32.mrb[21].mxu1 }
 0x1f9   : > { %v1198_v26 = vadd.f32 %v2592_v15, %v1197_v25  ;;  %v2105_v29 = vpop.f32.mrb[22].mxu1  ;;  %2146 = vmatprep.subr.msk.bf16.mxu0 %vm1479_vm1, %v1445_v22 }
 0x1fa   : > { %v1209_v32 = vadd.f32 %v2105_v29, %v2592_v15  ;;  %v1200_v33 = vpop.f32.mrb[23].mxu1  ;;  %1963 = vmatpush3.bf16.xpose.msra.mxu0 %v1484_v30  ;;  %v1394_v36 = vmax.f32 %v1206_v24, 0.0 }
 0x1fb   : > { %v1201_v35 = vadd.f32 %v2592_v15, %v1200_v33  ;;  %2147 = vmatprep.subr.msk.bf16.mxu0 %vm1479_vm1, %v1446_v21  ;;  %v1392_v38 = vmax.f32 %v1198_v26, 0.0 }
 0x1fc   : > { %v1395_v37 = vmax.f32 %v1209_v32, 0.0 }
 0x1fd   : > { %v1393_v39 = vmax.f32 %v1201_v35, 0.0 }
 0x1fe   : > { %v1448_v40 = vpack.c.bf16 %v1395_v37, %v1394_v36 }
 0x1ff   : > { %v1447_v44 = vpack.c.bf16 %v1393_v39, %v1392_v38  ;;  %v2108_v45 = vpop.f32.mrb[24].mxu1 }
 0x200   : > { %v1222_v28 = vadd.f32 %v2108_v45, %v2592_v15  ;;  %v1213_v46 = vpop.f32.mrb[25].mxu1 }
 0x201   : > { %v1214_v47 = vadd.f32 %v2592_v15, %v1213_v46  ;;  %v2109_v48 = vpop.f32.mrb[26].mxu1 }
 0x202   : > { %v1225_v50 = vadd.f32 %v2109_v48, %v2592_v15  ;;  %v1216_v51 = vpop.f32.mrb[27].mxu1  ;;  %1965 = vmatpush3.bf16.xpose.msra.mxu0 %v1487_v49  ;;  %v1398_v53 = vmax.f32 %v1222_v28, 0.0 }
 0x203   : > { %v1217_v52 = vadd.f32 %v2592_v15, %v1216_v51  ;;  %2148 = vmatprep.subr.msk.bf16.mxu0 %vm1479_vm1, %v1447_v44  ;;  %v1396_v55 = vmax.f32 %v1214_v47, 0.0 }
 0x204   : > { %v1399_v54 = vmax.f32 %v1225_v50, 0.0  ;;  %v1499_v50 = vsel %vm1479_vm1, %v2614_v56, 0 }
 0x205   : > { %v1397_v58 = vmax.f32 %v1217_v52, 0.0 }
 0x206   : > { %v1450_v59 = vpack.c.bf16 %v1399_v54, %v1398_v53 }
 0x207   : > { %v1449_v60 = vpack.c.bf16 %v1397_v58, %v1396_v55  ;;  %v2112_v61 = vpop.f32.mrb[28].mxu1 }
 0x208   : > { %v1238_v62 = vadd.f32 %v2112_v61, %v2592_v15  ;;  %v1229_v63 = vpop.f32.mrb[29].mxu1 }
 0x209   : > { %v1230_v27 = vadd.f32 %v2592_v15, %v1229_v63  ;;  %v2113_v0 = vpop.f32.mrb[30].mxu1 }
 0x20a   : > { %v1241_v2 = vadd.f32 %v2113_v0, %v2592_v15  ;;  %v1232_v3 = vpop.f32.mrb[31].mxu1  ;;  %1967 = vmatpush3.bf16.xpose.msra.mxu0 %v1490_v1  ;;  %v1402_v5 = vmax.f32 %v1238_v62, 0.0  ;;  %v1502_v1 = vsel %vm1479_vm1, %v2624_v7, 0 }
 0x20b   : > { %v1233_v4 = vadd.f32 %v2592_v15, %v1232_v3  ;;  %2149 = vmatprep.subr.msk.bf16.mxu0 %vm1479_vm1, %v1448_v40  ;;  %v1400_v9 = vmax.f32 %v1230_v27, 0.0 }
 0x20c   : > { %v1403_v8 = vmax.f32 %v1241_v2, 0.0 }
 0x20d   : > { %v1401_v10 = vmax.f32 %v1233_v4, 0.0 }
 0x20e   : > { %v2661_v11 = vpack.c.bf16 %v1403_v8, %v1402_v5 }
 0x20f   : > { %v1451_v12 = vpack.c.bf16 %v1401_v10, %v1400_v9  ;;  %v2116_v13 = vpop.f32.mrb[32].mxu1 }
 0x210   : > { %v1254_v14 = vadd.f32 %v2116_v13, %v2592_v15  ;;  %v1245_v17 = vpop.f32.mrb[33].mxu1 }
 0x211   : > { %v1246_v42 = vadd.f32 %v2592_v15, %v1245_v17  ;;  %v2117_v18 = vpop.f32.mrb[34].mxu1 }
 0x212   : > { %v1257_v20 = vadd.f32 %v2117_v18, %v2592_v15  ;;  %v1248_v43 = vpop.f32.mrb[35].mxu1  ;;  %1969 = vmatpush3.bf16.xpose.msra.mxu0 %v1493_v19  ;;  %v1406_v22 = vmax.f32 %v1254_v14, 0.0  ;;  %v1505_v19 = vsel %vm1479_vm1, %v2622_v6, 0 }
 0x213   : > { %v1249_v21 = vadd.f32 %v2592_v15, %v1248_v43  ;;  %2150 = vmatprep.subr.msk.bf16.mxu0 %vm1479_vm1, %v1449_v60  ;;  %v1404_v24 = vmax.f32 %v1246_v42, 0.0 }
 0x214   : > { %v1407_v23 = vmax.f32 %v1257_v20, 0.0 }
 0x215   : > { %v1405_v25 = vmax.f32 %v1249_v21, 0.0 }
 0x216   : > { %v2670_v26 = vpack.c.bf16 %v1407_v23, %v1406_v22 }
 0x217   : > { %v2672_v29 = vpack.c.bf16 %v1405_v25, %v1404_v24  ;;  %v2120_v30 = vpop.f32.mrb[36].mxu1 }
 0x218   : > { %v1270_v31 = vadd.f32 %v2120_v30, %v2592_v15  ;;  %v1261_v41 = vpop.f32.mrb[37].mxu1 }
 0x219   : > { %v1262_v32 = vadd.f32 %v2592_v15, %v1261_v41  ;;  %v2121_v33 = vpop.f32.mrb[38].mxu1  ;;  %v1532_v6 = vsel %vm1479_vm1, %v2672_v29, 0 }
 0x21a   : > { %v1273_v35 = vadd.f32 %v2121_v33, %v2592_v15  ;;  %v1264_v36 = vpop.f32.mrb[39].mxu1  ;;  %1971 = vmatpush3.bf16.xpose.msra.mxu0 %v1496_v34  ;;  %v1410_v38 = vmax.f32 %v1270_v31, 0.0 }
 0x21b   : > { %v1265_v37 = vadd.f32 %v2592_v15, %v1264_v36  ;;  %2151 = vmatprep.subr.msk.bf16.mxu0 %vm1479_vm1, %v1450_v59  ;;  %v1408_v40 = vmax.f32 %v1262_v32, 0.0 }
 0x21c   : > { %v1411_v39 = vmax.f32 %v1273_v35, 0.0 }
 0x21d   : > { %v1409_v44 = vmax.f32 %v1265_v37, 0.0 }
 0x21e   : > { %v2681_v45 = vpack.c.bf16 %v1411_v39, %v1410_v38 }
 0x21f   : > { %v2683_v28 = vpack.c.bf16 %v1409_v44, %v1408_v40  ;;  %v2124_v46 = vpop.f32.mrb[40].mxu1 }
 0x220   : > { %v1286_v47 = vadd.f32 %v2124_v46, %v2592_v15  ;;  %v1277_v57 = vpop.f32.mrb[41].mxu1 }
 0x221   : > { %v1278_v48 = vadd.f32 %v2592_v15, %v1277_v57  ;;  %v2125_v49 = vpop.f32.mrb[42].mxu1 }
 0x222   : > { %v1289_v51 = vadd.f32 %v2125_v49, %v2592_v15  ;;  %v1280_v52 = vpop.f32.mrb[43].mxu1  ;;  %1973 = vmatpush3.bf16.xpose.msra.mxu0 %v1499_v50  ;;  %v1414_v54 = vmax.f32 %v1286_v47, 0.0  ;;  %v1535_v49 = vsel %vm1479_vm1, %v2670_v26, 0 }
 0x223   : > { %v1281_v53 = vadd.f32 %v2592_v15, %v1280_v52  ;;  %2152 = vmatprep.subr.msk.bf16.mxu0 %vm1479_vm1, %v1451_v12  ;;  %v1412_v58 = vmax.f32 %v1278_v48, 0.0 }
 0x224   : > { %v1415_v55 = vmax.f32 %v1289_v51, 0.0 }
 0x225   : > { %v1413_v59 = vmax.f32 %v1281_v53, 0.0 }
 0x226   : > { %v2692_v60 = vpack.c.bf16 %v1415_v55, %v1414_v54 }
 0x227   : > { %v2694_v61 = vpack.c.bf16 %v1413_v59, %v1412_v58  ;;  %v2128_v62 = vpop.f32.mrb[44].mxu1 }
 0x228   : > { %v1302_v63 = vadd.f32 %v2128_v62, %v2592_v15  ;;  %v1293_v56 = vpop.f32.mrb[45].mxu1 }
 0x229   : > { %v1294_v27 = vadd.f32 %v2592_v15, %v1293_v56  ;;  %v2129_v0 = vpop.f32.mrb[46].mxu1 }
 0x22a   : > { %v1305_v2 = vadd.f32 %v2129_v0, %v2592_v15  ;;  %v1296_v3 = vpop.f32.mrb[47].mxu1  ;;  %1975 = vmatpush3.bf16.xpose.msra.mxu0 %v1502_v1  ;;  %v1418_v5 = vmax.f32 %v1302_v63, 0.0  ;;  %v1538_v1 = vsel %vm1479_vm1, %v2683_v28, 0  ;;  %v1541_v28 = vsel %vm1479_vm1, %v2681_v45, 0 }
 0x22b   : > { %v1297_v4 = vadd.f32 %v2592_v15, %v1296_v3  ;;  %2153 = vmatprep.subr.msk.bf16.mxu0 %vm1479_vm1, %v2661_v11  ;;  %v1416_v9 = vmax.f32 %v1294_v27, 0.0 }
 0x22c   : > { %v1419_v8 = vmax.f32 %v1305_v2, 0.0 }
 0x22d   : > { %v1417_v10 = vmax.f32 %v1297_v4, 0.0 }
 0x22e   : > { %v2704_v12 = vpack.c.bf16 %v1419_v8, %v1418_v5 }
 0x22f   : > { %v2706_v13 = vpack.c.bf16 %v1417_v10, %v1416_v9  ;;  %v2132_v14 = vpop.f32.mrb[48].mxu1 }
 0x230   : > { %v1318_v7 = vadd.f32 %v2132_v14, %v2592_v15  ;;  %v1309_v17 = vpop.f32.mrb[49].mxu1  ;;  %v1553_v45 = vsel %vm1479_vm1, %v2704_v12, 0 }
 0x231   : > { %v1310_v42 = vadd.f32 %v2592_v15, %v1309_v17  ;;  %v2133_v18 = vpop.f32.mrb[50].mxu1 }
 0x232   : > { %v1321_v11 = vadd.f32 %v2133_v18, %v2592_v15  ;;  %v1312_v20 = vpop.f32.mrb[51].mxu1  ;;  %1977 = vmatpush3.bf16.xpose.msra.mxu0 %v1505_v19  ;;  %v1422_v21 = vmax.f32 %v1318_v7, 0.0  ;;  %v1544_v18 = vsel %vm1479_vm1, %v2694_v61, 0  ;;  %v1547_v19 = vsel %vm1479_vm1, %v2692_v60, 0 }
 0x233   : > { %v1313_v43 = vadd.f32 %v2592_v15, %v1312_v20  ;;  %v1420_v23 = vmax.f32 %v1310_v42, 0.0  ;;  %v1475_v61 = vlaneseq }
 0x234   : > { %v1423_v22 = vmax.f32 %v1321_v11, 0.0 }
 0x235   : > { %v1421_v24 = vmax.f32 %v1313_v43, 0.0  ;;  %v1476_v11 = vshrl.u32 %v1475_v61, 7  ;;  %vm1716_vm2 = vcmp.lt.s32.totalorder %v1475_v61, 512 }
 0x236   : > { %v1462_v25 = vpack.c.bf16 %v1423_v22, %v1422_v21 }
 0x237   : > { %v1461_v30 = vpack.c.bf16 %v1421_v24, %v1420_v23  ;;  %v2136_v31 = vpop.f32.mrb[52].mxu1  ;;  %v1477_v20 = vsub.s32 0, %v1476_v11 }
 0x238   : > { %v1334_v41 = vadd.f32 %v2136_v31, %v2592_v15  ;;  %v1325_v32 = vpop.f32.mrb[53].mxu1 }
 0x239   : > { %2154 = vmatprep.subr.msk.bf16.mxu1 %vm1479_vm1, %v1461_v30  ;;  %v1326_v33 = vadd.f32 %v2592_v15, %v1325_v32  ;;  %v2137_v34 = vpop.f32.mrb[54].mxu1  ;;  %1979 = vmatmul.mubr.msk.bf16.vlgmr.msra.gmra.mrb[64].mxu0 %vm1479_vm1, %v2632_v16 }
 0x23a   : > { %1981 = vmatpush3.bf16.xpose.msra.mxu1 %v1532_v6  ;;  %v1426_v35 = vmax.f32 %v1334_v41, 0.0  ;;  %v1337_v36 = vadd.f32 %v2137_v34, %v2592_v15  ;;  %v1328_v37 = vpop.f32.mrb[55].mxu1 }
 0x23b   : > { %2155 = vmatprep.subr.msk.bf16.mxu1 %vm1479_vm1, %v1462_v25  ;;  %v1424_v38 = vmax.f32 %v1326_v33, 0.0  ;;  %v1329_v39 = vadd.f32 %v2592_v15, %v1328_v37 }
 0x23c   : > { %v1427_v40 = vmax.f32 %v1337_v36, 0.0 }
 0x23d   : > { %v1425_v44 = vmax.f32 %v1329_v39, 0.0 }
 0x23e   : > { %v1464_v46 = vpack.c.bf16 %v1427_v40, %v1426_v35 }
 0x23f   : > { %v1463_v29 = vpack.c.bf16 %v1425_v44, %v1424_v38  ;;  %v2140_v47 = vpop.f32.mrb[56].mxu1 }
 0x240   : > { %v1350_v57 = vadd.f32 %v2140_v47, %v2592_v15  ;;  %v1341_v48 = vpop.f32.mrb[57].mxu1 }
 0x241   : > { %v1342_v50 = vadd.f32 %v2592_v15, %v1341_v48  ;;  %v2141_v51 = vpop.f32.mrb[58].mxu1 }
 0x242   : > { %1983 = vmatpush3.bf16.xpose.msra.mxu1 %v1535_v49  ;;  %v1430_v52 = vmax.f32 %v1350_v57, 0.0  ;;  %v1353_v53 = vadd.f32 %v2141_v51, %v2592_v15  ;;  %v1344_v54 = vpop.f32.mrb[59].mxu1  ;;  %v2327_v49 = vmov 1966171168  }
 0x243   : > { %2156 = vmatprep.subr.msk.bf16.mxu1 %vm1479_vm1, %v1463_v29  ;;  %v1428_v55 = vmax.f32 %v1342_v50, 0.0  ;;  %v1345_v58 = vadd.f32 %v2592_v15, %v1344_v54  ;;  %v1692_v50 = vunpack.c.l.s4 %v2327_v49 }
 0x244   : > { %v1431_v59 = vmax.f32 %v1353_v53, 0.0 }
 0x245   : > { %v1429_v62 = vmax.f32 %v1345_v58, 0.0  ;;  %v1693_v51 = vunpack.c.0.s8 %v1692_v50 }
 0x246   : > { %v1466_v63 = vpack.c.bf16 %v1431_v59, %v1430_v52 }
 0x247   : > { %v1465_v56 = vpack.c.bf16 %v1429_v62, %v1428_v55  ;;  %v2144_v27 = vpop.f32.mrb[60].mxu1  ;;  %v1696_v52 = vsub.s32 %v1693_v51, %v1476_v11 }
 0x248   : > { %v1366_v26 = vadd.f32 %v2144_v27, %v2592_v15  ;;  %v1357_v0 = vpop.f32.mrb[61].mxu1 }
 0x249   : > { %v1358_v2 = vadd.f32 %v2592_v15, %v1357_v0  ;;  %v2145_v3 = vpop.f32.mrb[62].mxu1 }
 0x24a   : > { %1985 = vmatpush3.bf16.xpose.msra.mxu1 %v1538_v1  ;;  %v1434_v4 = vmax.f32 %v1366_v26, 0.0  ;;  %v1369_v5 = vadd.f32 %v2145_v3, %v2592_v15  ;;  %v1360_v8 = vpop.f32.mrb[63].mxu1 }
 0x24b   : > { %2157 = vmatprep.subr.msk.bf16.mxu1 %vm1479_vm1, %v1464_v46  ;;  %v1432_v9 = vmax.f32 %v1358_v2, 0.0  ;;  %v1361_v10 = vadd.f32 %v2592_v15, %v1360_v8  ;;  %v1550_v15 = vsel %vm1479_vm1, %v2706_v13, 0 }
 0x24c   : > { %v1435_v14 = vmax.f32 %v1369_v5, 0.0 }
 0x24d   : > { %v1433_v7 = vmax.f32 %v1361_v10, 0.0 }
 0x24e   : > { %v1468_v17 = vpack.c.bf16 %v1435_v14, %v1434_v4 }
 0x24f   : > { %v1467_v42 = vpack.c.bf16 %v1433_v7, %v1432_v9 }
 0x252   : > { %1987 = vmatpush3.bf16.xpose.msra.mxu1 %v1541_v28 }
 0x253   : > { %2158 = vmatprep.subr.msk.bf16.mxu1 %vm1479_vm1, %v1465_v56 }
 0x25a   : > { %1989 = vmatpush3.bf16.xpose.msra.mxu1 %v1544_v18 }
 0x25b   : > { %2159 = vmatprep.subr.msk.bf16.mxu1 %vm1479_vm1, %v1466_v63 }
 0x25d   : > { %v1473_v60 = vpop.permute.xlu0 %1472 }
 0x25e   : > { %v1478_v43 = vrot.slane %v1473_v60, %v1477_v20 }
 0x262   : > { %1991 = vmatpush3.bf16.xpose.msra.mxu1 %v1547_v19 }
 0x263   : > { %2160 = vmatprep.subr.msk.bf16.mxu1 %vm1479_vm1, %v1467_v42 }
 0x26a   : > { %1993 = vmatpush3.bf16.xpose.msra.mxu1 %v1550_v15 }
 0x26b   : > { %2161 = vmatprep.subr.msk.bf16.mxu1 %vm1479_vm1, %v1468_v17 }
 0x272   : > { %1995 = vmatpush3.bf16.xpose.msra.mxu1 %v1553_v45 }
 0x279   : > { %1997 = vmatmul.mubr.msk.bf16.vlgmr.msra.gmra.mrb[64].mxu1 %vm1479_vm1, %v2632_v16 }
 0x30c   : > { %v1613_v21 = vpop.f32.mrb[64].mxu0 }
 0x30d   : > { %v1614_v22 = vadd.f32 %v1613_v21, %v1478_v43  ;;  %v1615_v23 = vpop.f32.mrb[65].mxu0 }
 0x30e   : > { %v1616_v24 = vadd.f32 %v1615_v23, %v1478_v43  ;;  %v1617_v13 = vpop.f32.mrb[66].mxu0 }
 0x30f   : > { %v1878_v25 = vmul.f32 -1.442695, %v1614_v22  ;;  %v1618_v30 = vpop.f32.mrb[67].mxu0 }
 0x310   : > { %v1879_v31 = vmul.f32 -1.442695, %v1616_v24 }
 0x311   : > { %2246 = vpow2.f32 %v1878_v25 }
 0x312   : > { %2248 = vpow2.f32 %v1879_v31 }
 0x31b   : > { %v2247_v12 = vpop.eup %2246 }
 0x31c   : > { %v2249_v41 = vpop.eup %2248  ;;  %v1673_v32 = vadd.f32 1.0, %v2247_v12 }
 0x31d   : > { %v1674_v6 = vadd.f32 1.0, %v2249_v41 }
 0x31e   : > { %2250 = vrcp.f32 %v1673_v32 }
 0x31f   : > { %2252 = vrcp.f32 %v1674_v6 }
 0x328   : > { %v2251_v16 = vpop.eup %2250 }
 0x329   : > { %v2253_v33 = vpop.eup %2252 }
 0x32a   : > { %v1689_v34 = vcombine.low %v2251_v16, %v2253_v33 }
 0x32c   : > { %v1697_v58 = vrot.slane %v1689_v34, %v1696_v52 }
 0x34c   : > { %v1654_v35 = vpop.f32.mrb[64].mxu1 }
 0x34d   : > { %v1655_v36 = vadd.f32 %v1654_v35, %v1478_v43  ;;  %v1656_v37 = vpop.f32.mrb[65].mxu1 }
 0x34e   : > { %v1657_v38 = vadd.f32 %v1656_v37, %v1478_v43  ;;  %v1658_v39 = vpop.f32.mrb[66].mxu1 }
 0x34f   : > { %v1880_v40 = vmul.f32 -1.442695, %v1655_v36  ;;  %v1659_v44 = vpop.f32.mrb[67].mxu1 }
 0x350   : > { %v1881_v46 = vmul.f32 -1.442695, %v1657_v38 }
 0x351   : > { %2254 = vpow2.f32 %v1880_v40 }
 0x352   : > { %2256 = vpow2.f32 %v1881_v46 }
 0x35b   : > { %v2255_v29 = vpop.eup %2254 }
 0x35c   : > { %v2257_v47 = vpop.eup %2256  ;;  %v1675_v57 = vadd.f32 1.0, %v2255_v29 }
 0x35d   : > { %v1676_v48 = vadd.f32 1.0, %v2257_v47 }
 0x35e   : > { %2258 = vrcp.f32 %v1675_v57 }
 0x35f   : > { %2260 = vrcp.f32 %v1676_v48 }
 0x368   : > { %v2259_v53 = vpop.eup %2258 }
 0x369   : > { %v2261_v54 = vpop.eup %2260 }
 0x36a   : > { %v1690_v55 = vcombine.low %v2259_v53, %v2261_v54 }
 0x36c   : > { %v1704_v59 = vrot.slane %v1690_v55, %v1696_v52 }
 0x36e   : > { %v1705_v62 = vcombine.low %v1697_v58, %v1704_v59 }
 0x370   : > { %v1712_v63 = vrot.slane %v1705_v62, %v1696_v52 }
 0x372   : > { %1718 = vst.msk [vmem:[%s274_s18] sm:$0xf] %vm1716_vm2, %v1712_v63 }
 0x373   : > { %2275 = shalt.err (!%p2272_p3)
}
 0x374   : > { %s2276_s16 = scalar_lea.hbm %s2759_s22, 64  ;;  %s2280_s14 = scalar_lea.hbm %s2808_s7, 128 }
 0x375   : > { %p2277_p4 = scmp.ne.s32.totalorder %s2759_s22, %s2276_s16  ;;  %p2281_p9 = scmp.lt.u32.totalorder %s2759_s22, %s2808_s7 }
 0x376   : > { %p2282_p10 = scmp.lt.u32.totalorder %s2280_s14, %s2276_s16  ;;  %p2284_p12 = scmp.lt.u32.totalorder %s2276_s16, %s2759_s22 }
 0x377   : > { %p2278_p7 = pnand %p2277_p4, %p2407_p5 }
 0x378   : > { %p2283_p11 = por %p2282_p10, %p2281_p9 }
 0x379   : > { %p2279_p8 = pneg %p2278_p7 }
 0x37a   : > { %p2285_p13 = por %p2284_p12, %p2283_p11 }
 0x37c   : > { %p2286_p0 = pnand %p2285_p13, %p2279_p8 }
 0x37e   : > { %2289 = shalt.err (!%p2286_p0)
}
 0x37f   : > { %2162 = dma.vmem_to_hbm [thread:$0]  (%p2407_p5), %s2761_s19, 64, %s2759_s22, %s1720_s23  }
 0x380 PF: > { %p2168_p1 = scmp.ge.s32.totalorder %s2324_s29, 2  ;;  %s1746_s18 = sand.u32 1, %s2312_s26  }
 0x381   : > { %s1747_s20 = scalar_lea.sflag [#allocation4], %s1746_s18 }
 0x382   : > { %p2165_p2 = pnand %p2168_p1, %p2411_p6 }
 0x384   : > { %2307 = dma.done.wait (!%p2165_p2), %s1747_s20, 64  }
 0x385   : > { %2309 = vsyncadd (!%p2165_p2), %s1747_s20, 4294967232  ;;  %p19_p3 = scmp.ge.s32.totalorder %s2395_s8, 4   ;;  %s2811_s26 = smov %s2316_s27 }
 0x386   : > { %s2812_s27 = smov %s2320_s28  ;;  %s2813_s28 = smov %s2405_s11 }
 0x387   : > { %s2814_s29 = smov %s2395_s8  ;;  %21 = sbr.rel (!%p19_p3) target bundleno = 6 (0x6), region = 83 }
 0x38e   :  { %1752 = vsyncpa [#allocation4], 1 }
 0x38f   :  { %1754 = vsyncpa [#allocation4 + $0x1], 1 }

</bundles_post_ra>
